<compile_context>
chip_gen: v7x
topology: tpu7x:2x2x1
jax: 0.10.0
libtpu: 0.0.40
codegen_flags: <defaults>
</compile_context>

<pallas_src>
import functools

import jax
import jax.numpy as jnp
from jax.experimental import pallas as pl
from jax.experimental.pallas import tpu as pltpu


def _round_up(v, m):
    return (v + m - 1) // m * m


def _pad_cols(a, n):
    return jnp.pad(a, ((0, 0), (0, n - a.shape[1])))


def _pad_rows(a, n):
    return jnp.pad(a, ((0, n - a.shape[0]), (0, 0)))


def _relu(t):
    return jnp.maximum(t, 0.0)


# ----------------------------------------------------------------------------- #
# Kernel 1: node-wise projections (lin_in + fused conv projections + pos_nn L1)  #
# ----------------------------------------------------------------------------- #
def _project_kernel(x_ref, pos_ref, w_in_ref, b_in_ref, w_fused_ref, wp1_ref,
                    proj_ref, pp_ref):
    f32 = jnp.float32
    h = _relu(jnp.dot(x_ref[...], w_in_ref[...], preferred_element_type=f32)
              + b_in_ref[...])                                          # [Tp, Cin] f32
    # fused lane-dense [Cin, 128] projection: cols = [lin | lin_src | lin_dst | 0]
    proj_ref[...] = jnp.dot(h.astype(jnp.bfloat16), w_fused_ref[...],
                            preferred_element_type=f32).astype(proj_ref.dtype)
    # pos_nn layer-1 (linear part only; bias is folded into the i-tile in kernel 2)
    pp_ref[...] = jnp.dot(pos_ref[...], wp1_ref[...],
                          preferred_element_type=f32).astype(pp_ref.dtype)


# ----------------------------------------------------------------------------- #
# Kernel 2: pairwise pos_nn / attn_nn, feature-wise softmax, aggregation, lin_out #
# ----------------------------------------------------------------------------- #
def _attn_kernel(mask_ref, proj_ref, pp_ref,
                 bp1_ref, wp2_ref, bp2_ref,
                 wa1_ref, ba1_ref, wa2_ref, ba2_ref,
                 w_out_ref, b_out_ref,
                 y_ref, *, ew_dtype):
    f32 = jnp.float32
    bf16 = jnp.bfloat16
    ew = ew_dtype                        # elementwise dtype (bf16 on v6e/v7x, f32 on v5e)
    ti, c = y_ref.shape                  # target-node tile, out_channels
    n = pp_ref.shape[0]                  # padded node count (sources)
    hp = pp_ref.shape[1]                 # padded pos_nn hidden (128)

    r0 = pl.multiple_of(pl.program_id(0) * ti, ti)

    m = mask_ref[...].astype(ew)                             # [Ti, N]
    proj = proj_ref[...]                                     # [N, 128] bf16 (resident)
    v = proj[:, :c].astype(ew)                               # lin(x)_j      [N, C]
    a_src = proj[:, c:2 * c].astype(ew)                      # lin_src(x)_j  [N, C]
    proj_i = proj_ref[pl.ds(r0, ti), :]                      # [Ti, 128] bf16
    a_dst = proj_i[:, 2 * c:3 * c].astype(ew)                # lin_dst(x)_i  [Ti, C]

    pp = pp_ref[...].astype(ew)                              # [N, Hp]
    pp_i = pp_ref[pl.ds(r0, ti), :].astype(ew) + bp1_ref[...]   # [Ti, Hp] (bias folded once)

    # ---- pos_nn: delta_ij = relu(relu(pp_i + b1 - pp_j) @ Wp2 + b2) ----
    ph = _relu(pp_i[:, None, :] - pp[None, :, :])            # [Ti, N, Hp]  ew
    delta = _relu(
        jnp.dot(ph.reshape(ti * n, hp).astype(bf16), wp2_ref[...],
                preferred_element_type=ew) + bp2_ref[...]
    ).reshape(ti, n, c)                                      # [Ti, N, C]  ew

    # ---- attn_nn: alpha_ij = MLP(a_dst_i - a_src_j + delta_ij) ----
    ai = a_dst[:, None, :] - a_src[None, :, :] + delta       # [Ti, N, C]  ew
    ah = _relu(
        jnp.dot(ai.reshape(ti * n, c).astype(bf16), wa1_ref[...],
                preferred_element_type=ew) + ba1_ref[...])   # [Ti*N, Ha]  ew
    alpha = _relu(
        jnp.dot(ah.astype(bf16), wa2_ref[...],
                preferred_element_type=ew) + ba2_ref[...]
    ).reshape(ti, n, c)                                      # [Ti, N, C]  ew

    # ---- feature-wise masked softmax over sources j, fused with aggregation ----
    # alpha >= 0 (post-relu), so max_j(mask*alpha) equals the reference's masked max.
    # Exponent <= 0 everywhere (no overflow) and the max-achieving neighbour gives
    # exp(0)=1, so den >= 1 per channel (self-loops) -> no underflow, finite recip.
    mm = m[:, :, None]                                       # [Ti, N, 1]
    am = alpha * mm                                          # [Ti, N, C]
    a_max = jnp.max(am, axis=1, keepdims=True)               # [Ti, 1, C]
    e = jnp.exp(am - a_max) * mm                             # [Ti, N, C]  ew
    num = jnp.sum((e * (v[None, :, :] + delta)).astype(f32), axis=1)   # [Ti, C] f32
    den = jnp.sum(e.astype(f32), axis=1)                     # [Ti, C] f32 (>= 1)
    out = num * pl.reciprocal(den, approx=True)              # [Ti, C]

    # ---- lin_out + relu ----
    y_ref[...] = _relu(
        jnp.dot(out, w_out_ref[...], preferred_element_type=f32) + b_out_ref[...]
    )


# ----------------------------------------------------------------------------- #
# Host-side wrapper                                                              #
# ----------------------------------------------------------------------------- #
def _dense_mask(edge_index, n):
    # mask[i, j] = 1 iff edge j -> i; strip self-loops then add them back
    # (matches PointTransformerConv add_self_loops behaviour).
    src, dst = edge_index[0], edge_index[1]
    mask = jnp.zeros((n, n), jnp.float32).at[dst, src].set(1.0)
    eye = jnp.eye(n, dtype=jnp.float32)
    return mask * (1.0 - eye) + eye


def _tpu_flavor():
    """Best-effort TPU generation sniff for tile / precision / VMEM budgets."""
    try:
        kind = jax.devices()[0].device_kind.lower()
    except Exception:
        kind = ""
    big_vmem = any(g in kind for g in ("v4", "v5", "v6"))          # 128 MiB VMEM parts
    ew_bf16 = not any(g in kind for g in ("v2", "v3", "v4", "v5"))  # bf16 VPU/EUP (v6e+)
    return big_vmem, ew_bf16


def transformer_block(x, pos, edge_index, params, *, tile_i=None):
    n_real, cin = x.shape
    c = params["w_out"].shape[1]
    bf16 = jnp.bfloat16

    big_vmem, ew_bf16 = _tpu_flavor()
    ew = bf16 if ew_bf16 else jnp.float32

    # ---- generation-aware budgets ------------------------------------------------
    # kernel 2 keeps ~6 live [tile_i*N, 128]-lane intermediates of `ew` dtype; keep
    # that a comfortable fraction of per-core VMEM (128 MiB on v4/v5/v6, 64 MiB per
    # TensorCore on v7x / unknown).
    if big_vmem:
        vmem_limit = 96 * 1024 * 1024
        pair_budget = 32768 if ew_bf16 else 16384
    else:
        vmem_limit = 40 * 1024 * 1024
        pair_budget = 8192 if ew_bf16 else 4096

    # ---- tile / padding choices --------------------------------------------------
    n_base = _round_up(n_real, 16)
    auto_tile = tile_i is None
    if auto_tile:
        tile_i = pair_budget // max(n_base, 1)
    tile_i = max(16, min(256, _round_up(int(tile_i), 16)))
    tile_i = min(tile_i, n_base)
    n_pad = _round_up(n_base, tile_i)
    grid_i = n_pad // tile_i
    # Keep >= 2 i-tiles when possible so ("parallel",) can split across v7x's 2 TCs.
    if auto_tile and grid_i == 1 and n_pad >= 32 and (n_pad // 2) % 16 == 0:
        tile_i = n_pad // 2
        grid_i = 2

    # kernel 1 is node-wise and VMEM-light: decouple its tile from tile_i and use
    # the largest row tile (<= 512) that still divides n_pad.
    tile_p = tile_i
    for k in range(grid_i, 0, -1):
        if grid_i % k == 0 and tile_i * k <= 512:
            tile_p = tile_i * k
            break
    grid_p = n_pad // tile_p

    # ---- padded node arrays + bf16 adjacency mask --------------------------------
    x_p = jnp.zeros((n_pad, cin), jnp.float32).at[:n_real].set(x)
    pos_p = jnp.zeros((n_pad, 3), jnp.float32).at[:n_real].set(pos)
    # padded (fake) nodes only get a self-loop, so they never touch real rows and
    # their own rows stay finite before being sliced away.
    mask = _dense_mask(edge_index, n_pad).astype(bf16)

    # ---- weight packing (bf16 MXU operands, lane-dense shapes) -------------------
    # fuse conv.lin / conv.lin_src / conv.lin_dst into one matmul, zero-padded to a
    # lane-dense 128-wide output so kernel 1's store is an unmasked vst.
    pc = _round_up(3 * c, 128)
    w_fused = _pad_cols(
        jnp.concatenate([params["w_lin"], params["w_src"], params["w_dst"]], axis=1),
        pc).astype(bf16)
    # zero-pad the 64-wide MLP hiddens to the 128-lane width (exactly equivalent math)
    hp = _round_up(params["wp1"].shape[1], 128)
    wp1 = _pad_cols(params["wp1"], hp)
    bp1 = _pad_cols(params["bp1"], hp).astype(ew)
    wp2 = _pad_rows(params["wp2"], hp).astype(bf16)
    bp2 = params["bp2"].astype(ew)
    ha = _round_up(params["wa1"].shape[1], 128)
    wa1 = _pad_cols(params["wa1"], ha).astype(bf16)
    ba1 = _pad_cols(params["ba1"], ha).astype(ew)
    wa2 = _pad_rows(params["wa2"], ha).astype(bf16)
    ba2 = params["ba2"].astype(ew)

    cparams = pltpu.CompilerParams(
        dimension_semantics=("parallel",),
        vmem_limit_bytes=vmem_limit,
    )

    def full(arr):
        # whole-array block, identical for every grid step (grid-invariant).
        return pl.BlockSpec(arr.shape, lambda i: (0,) * arr.ndim)

    # ---- kernel 1: node-wise projections (large node tile, own grid) -------------
    proj, pp = pl.pallas_call(
        _project_kernel,
        out_shape=(jax.ShapeDtypeStruct((n_pad, pc), bf16),
                   jax.ShapeDtypeStruct((n_pad, hp), bf16)),
        grid=(grid_p,),
        in_specs=[
            pl.BlockSpec((tile_p, cin), lambda i: (i, 0)),
            pl.BlockSpec((tile_p, 3), lambda i: (i, 0)),
            full(params["w_in"]), full(params["b_in"]), full(w_fused), full(wp1),
        ],
        out_specs=(pl.BlockSpec((tile_p, pc), lambda i: (i, 0)),
                   pl.BlockSpec((tile_p, hp), lambda i: (i, 0))),
        compiler_params=cparams,
    )(x_p, pos_p, params["w_in"], params["b_in"], w_fused, wp1)

    # ---- kernel 2: pairwise attention / aggregation, tiled over target nodes -----
    attn = functools.partial(_attn_kernel, ew_dtype=ew)
    y = pl.pallas_call(
        attn,
        out_shape=jax.ShapeDtypeStruct((n_pad, c), jnp.float32),
        grid=(grid_i,),
        in_specs=[
            pl.BlockSpec((tile_i, n_pad), lambda i: (i, 0)),   # mask rows for this tile
            full(proj), full(pp),
            full(bp1), full(wp2), full(bp2),
            full(wa1), full(ba1), full(wa2), full(ba2),
            full(params["w_out"]), full(params["b_out"]),
        ],
        out_specs=pl.BlockSpec((tile_i, c), lambda i: (i, 0)),
        compiler_params=cparams,
    )(mask, proj, pp, bp1, wp2, bp2, wa1, ba1, wa2, ba2,
      params["w_out"], params["b_out"])

    return y[:n_real]


# ----------------------------------------------------------------------------- #
# Parameter init (PyTorch nn.Linear-style), weights stored as [in, out]          #
# ----------------------------------------------------------------------------- #
def init_params(key, in_channels, out_channels, hidden=64):
    def lin(k, fan_in, fan_out, bias=True):
        k1, k2 = jax.random.split(k)
        bound = 1.0 / float(fan_in) ** 0.5
        w = jax.random.uniform(k1, (fan_in, fan_out), jnp.float32, -bound, bound)
        if not bias:
            return w, None
        b = jax.random.uniform(k2, (1, fan_out), jnp.float32, -bound, bound)
        return w, b

    ks = jax.random.split(key, 9)
    w_in, b_in = lin(ks[0], in_channels, in_channels)                 # lin_in
    w_lin, _ = lin(ks[1], in_channels, out_channels, bias=False)      # conv.lin
    w_src, _ = lin(ks[2], in_channels, out_channels, bias=False)      # conv.lin_src
    w_dst, _ = lin(ks[3], in_channels, out_channels, bias=False)      # conv.lin_dst
    wp1, bp1 = lin(ks[4], 3, hidden)                                  # pos_nn layer 1
    wp2, bp2 = lin(ks[5], hidden, out_channels)                       # pos_nn layer 2
    wa1, ba1 = lin(ks[6], out_channels, hidden)                       # attn_nn layer 1
    wa2, ba2 = lin(ks[7], hidden, out_channels)                       # attn_nn layer 2
    w_out, b_out = lin(ks[8], out_channels, out_channels)             # lin_out
    return dict(
        w_in=w_in, b_in=b_in, w_lin=w_lin, w_src=w_src, w_dst=w_dst,
        wp1=wp1, bp1=bp1, wp2=wp2, bp2=bp2,
        wa1=wa1, ba1=ba1, wa2=wa2, ba2=ba2,
        w_out=w_out, b_out=b_out,
    )


def reference(x, pos, edge_index, params):
    """Plain-JAX f32 reference of the same forward pass (for validation)."""
    n = x.shape[0]
    mask = _dense_mask(edge_index, n)
    h = _relu(x @ params["w_in"] + params["b_in"])
    v = h @ params["w_lin"]
    a_src = h @ params["w_src"]
    a_dst = h @ params["w_dst"]
    rel = pos[:, None, :] - pos[None, :, :]                             # [N, N, 3]
    delta = _relu(_relu(rel @ params["wp1"] + params["bp1"]) @ params["wp2"]
                  + params["bp2"])                                      # [N, N, C]
    ai = a_dst[:, None, :] - a_src[None, :, :] + delta
    alpha = _relu(_relu(ai @ params["wa1"] + params["ba1"]) @ params["wa2"]
                  + params["ba2"])
    m = mask[:, :, None]
    am = jnp.where(m > 0, alpha, -1e30)
    w = jnp.exp(am - am.max(axis=1, keepdims=True)) * m
    w = w / w.sum(axis=1, keepdims=True)
    out = (w * (v[None, :, :] + delta)).sum(axis=1)
    return _relu(out @ params["w_out"] + params["b_out"])


if __name__ == "__main__":
    key = jax.random.PRNGKey(0)
    N, C_IN, C_OUT, E = 24, 16, 32, 64

    kx, kp, ks, kd, kw = jax.random.split(key, 5)
    x = jax.random.normal(kx, (N, C_IN), jnp.float32)
    pos = jax.random.normal(kp, (N, 3), jnp.float32)
    src = jax.random.randint(ks, (E,), 0, N, dtype=jnp.int32)
    dst = jax.random.randint(kd, (E,), 0, N, dtype=jnp.int32)
    edge_index = jnp.stack([src, dst])  # [2, E], row 0 = source, row 1 = target

    params = init_params(kw, C_IN, C_OUT)

    # auto tiling -> padded N=32, grid of 2 target-node tiles (exercises the tiled
    # path and the ">=2 i-tiles" adjustment).
    y = transformer_block(x, pos, edge_index, params, tile_i=None)
    y = jax.block_until_ready(y)

    y_ref = reference(x, pos, edge_index, params)
    assert y.shape == (N, C_OUT)
    assert bool(jnp.all(jnp.isfinite(y)))
    max_err = float(jnp.max(jnp.abs(y - y_ref)))
    # tolerance accounts for the bf16 storage of proj/pp and the bf16 pairwise
    # elementwise path on v6e/v7x (f32 reference).
    assert bool(jnp.allclose(y, y_ref, rtol=3e-2, atol=3e-2)), max_err

    print("KERNEL_OK")
</pallas_src>

<mosaic_0001>
module attributes {stable_mosaic.version = 11 : i64} {
  func.func @_project_kernel(%arg0: i32, %arg1: memref<32x16xf32, #tpu.memory_space<vmem>>, %arg2: memref<32x3xf32, #tpu.memory_space<vmem>>, %arg3: memref<16x16xf32, #tpu.memory_space<vmem>>, %arg4: memref<1x16xf32, #tpu.memory_space<vmem>>, %arg5: memref<16x128xbf16, #tpu.memory_space<vmem>>, %arg6: memref<3x128xf32, #tpu.memory_space<vmem>>, %arg7: memref<32x128xbf16, #tpu.memory_space<vmem>>, %arg8: memref<32x128xbf16, #tpu.memory_space<vmem>>) attributes {dimension_semantics = [#tpu.dimension_semantics<parallel>], iteration_bounds = array<i64: 1>, scalar_prefetch = 0 : i64, scratch_operands = 0 : i64, tpu.core_type = #tpu.core_type<tc>, window_params = [{transform_indices = @transform_0, window_bounds = array<i64: 32, 16>}, {transform_indices = @transform_1, window_bounds = array<i64: 32, 3>}, {pipeline_mode = #tpu.pipeline_mode<synchronous>, transform_indices = @transform_2, window_bounds = array<i64: 16, 16>}, {pipeline_mode = #tpu.pipeline_mode<synchronous>, transform_indices = @transform_3, window_bounds = array<i64: 1, 16>}, {pipeline_mode = #tpu.pipeline_mode<synchronous>, transform_indices = @transform_4, window_bounds = array<i64: 16, 128>}, {pipeline_mode = #tpu.pipeline_mode<synchronous>, transform_indices = @transform_5, window_bounds = array<i64: 3, 128>}, {transform_indices = @transform_6, window_bounds = array<i64: 32, 128>}, {transform_indices = @transform_7, window_bounds = array<i64: 32, 128>}]} {
    %c0 = arith.constant 0 : index
    %c0_0 = arith.constant 0 : index
    %0 = vector.load %arg1[%c0, %c0_0] : memref<32x16xf32, #tpu.memory_space<vmem>>, vector<32x16xf32>
    %c0_1 = arith.constant 0 : index
    %c0_2 = arith.constant 0 : index
    %1 = vector.load %arg3[%c0_1, %c0_2] : memref<16x16xf32, #tpu.memory_space<vmem>>, vector<16x16xf32>
    %cst = arith.constant dense<0.000000e+00> : vector<32x16xf32>
    %2 = tpu.matmul %0, %1, %cst {dimension_numbers = #tpu.dot_dimension_numbers<[1], [0], [0], [1], [0, 0, 1, 1], [], []>} : vector<32x16xf32>, vector<16x16xf32>, vector<32x16xf32> -> vector<32x16xf32>
    %c0_3 = arith.constant 0 : index
    %c0_4 = arith.constant 0 : index
    %3 = vector.load %arg4[%c0_3, %c0_4] : memref<1x16xf32, #tpu.memory_space<vmem>>, vector<1x16xf32>
    %4 = vector.broadcast %3 : vector<1x16xf32> to vector<32x16xf32>
    %5 = arith.addf %2, %4 : vector<32x16xf32>
    %cst_5 = arith.constant 0.000000e+00 : f32
    %6 = vector.broadcast %cst_5 : f32 to vector<32x16xf32>
    %7 = arith.maximumf %5, %6 : vector<32x16xf32>
    %8 = arith.truncf %7 : vector<32x16xf32> to vector<32x16xbf16>
    %c0_6 = arith.constant 0 : index
    %c0_7 = arith.constant 0 : index
    %9 = vector.load %arg5[%c0_6, %c0_7] : memref<16x128xbf16, #tpu.memory_space<vmem>>, vector<16x128xbf16>
    %cst_8 = arith.constant dense<0.000000e+00> : vector<32x128xf32>
    %10 = tpu.matmul %8, %9, %cst_8 {dimension_numbers = #tpu.dot_dimension_numbers<[1], [0], [0], [1], [0, 0, 1, 1], [], []>} : vector<32x16xbf16>, vector<16x128xbf16>, vector<32x128xf32> -> vector<32x128xf32>
    %11 = arith.truncf %10 : vector<32x128xf32> to vector<32x128xbf16>
    %c0_9 = arith.constant 0 : index
    %c0_10 = arith.constant 0 : index
    %12 = vector.load %arg7[%c0_9, %c0_10] : memref<32x128xbf16, #tpu.memory_space<vmem>>, vector<32x128xbf16>
    tpu.vector_store %arg7[%c0_9, %c0_10], %11 {strides = array<i32>} : memref<32x128xbf16, #tpu.memory_space<vmem>>, vector<32x128xbf16>,
    %c0_11 = arith.constant 0 : index
    %c0_12 = arith.constant 0 : index
    %13 = vector.load %arg2[%c0_11, %c0_12] : memref<32x3xf32, #tpu.memory_space<vmem>>, vector<32x3xf32>
    %c0_13 = arith.constant 0 : index
    %c0_14 = arith.constant 0 : index
    %14 = vector.load %arg6[%c0_13, %c0_14] : memref<3x128xf32, #tpu.memory_space<vmem>>, vector<3x128xf32>
    %cst_15 = arith.constant dense<0.000000e+00> : vector<32x128xf32>
    %15 = tpu.matmul %13, %14, %cst_15 {dimension_numbers = #tpu.dot_dimension_numbers<[1], [0], [0], [1], [0, 0, 1, 1], [], []>} : vector<32x3xf32>, vector<3x128xf32>, vector<32x128xf32> -> vector<32x128xf32>
    %16 = arith.truncf %15 : vector<32x128xf32> to vector<32x128xbf16>
    %c0_16 = arith.constant 0 : index
    %c0_17 = arith.constant 0 : index
    %17 = vector.load %arg8[%c0_16, %c0_17] : memref<32x128xbf16, #tpu.memory_space<vmem>>, vector<32x128xbf16>
    tpu.vector_store %arg8[%c0_16, %c0_17], %16 {strides = array<i32>} : memref<32x128xbf16, #tpu.memory_space<vmem>>, vector<32x128xbf16>,
    return
  }
  func.func @transform_0(%arg0: i32) -> (i32, i32) {
    %c0_i32 = arith.constant 0 : i32
    %c0_i32_0 = arith.constant 0 : i32
    return %arg0, %c0_i32 : i32, i32
  }
  func.func @transform_1(%arg0: i32) -> (i32, i32) {
    %c0_i32 = arith.constant 0 : i32
    %c0_i32_0 = arith.constant 0 : i32
    return %arg0, %c0_i32 : i32, i32
  }
  func.func @transform_2(%arg0: i32) -> (i32, i32) {
    %c0_i32 = arith.constant 0 : i32
    %c0_i32_0 = arith.constant 0 : i32
    %c0_i32_1 = arith.constant 0 : i32
    return %c0_i32, %c0_i32_0 : i32, i32
  }
  func.func @transform_3(%arg0: i32) -> (i32, i32) {
    %c0_i32 = arith.constant 0 : i32
    %c0_i32_0 = arith.constant 0 : i32
    %c0_i32_1 = arith.constant 0 : i32
    return %c0_i32, %c0_i32_0 : i32, i32
  }
  func.func @transform_4(%arg0: i32) -> (i32, i32) {
    %c0_i32 = arith.constant 0 : i32
    %c0_i32_0 = arith.constant 0 : i32
    %c0_i32_1 = arith.constant 0 : i32
    return %c0_i32, %c0_i32_0 : i32, i32
  }
  func.func @transform_5(%arg0: i32) -> (i32, i32) {
    %c0_i32 = arith.constant 0 : i32
    %c0_i32_0 = arith.constant 0 : i32
    %c0_i32_1 = arith.constant 0 : i32
    return %c0_i32, %c0_i32_0 : i32, i32
  }
  func.func @transform_6(%arg0: i32) -> (i32, i32) {
    %c0_i32 = arith.constant 0 : i32
    %c0_i32_0 = arith.constant 0 : i32
    return %arg0, %c0_i32 : i32, i32
  }
  func.func @transform_7(%arg0: i32) -> (i32, i32) {
    %c0_i32 = arith.constant 0 : i32
    %c0_i32_0 = arith.constant 0 : i32
    return %arg0, %c0_i32 : i32, i32
  }
}

</mosaic_0001>

<bundles_post_ra>
// kernel: tpu_custom_call.1
= control target key start
LH: loop header
LB: loop body
LE: loop exit
PB: predicated region body
PF: predicated region fallthrough
CT: control target
= control target key end

     0   :  { %13 = vsyncpa [#allocation3], 0  ;;  %vm41_vm0 = vcmask 130048   ;;  %s648_s0 = inlined_call_operand.vmem [shape: f32[32,16], index: 0, kind: input, shape index: {}]   ;;  %s649_s1 = inlined_call_operand.vmem [shape: f32[32,3], index: 1, kind: input, shape index: {}]   ;;  %s650_s2 = inlined_call_operand.vmem [shape: f32[16,16], index: 2, kind: input, shape index: {}]   ;;  %s651_s3 = inlined_call_operand.vmem [shape: f32[1,16], index: 3, kind: input, shape index: {}]   ;;  %s652_s4 = inlined_call_operand.vmem [shape: bf16[16,128], index: 4, kind: input, shape index: {}]   ;;  %s653_s5 = inlined_call_operand.vmem [shape: f32[3,128], index: 5, kind: input, shape index: {}]   ;;  %s654_s6 = inlined_call_operand.hbm [shape: bf16[32,128], index: 6, kind: output, shape index: {0}]   ;;  %s655_s7 = inlined_call_operand.hbm [shape: bf16[32,128], index: 7, kind: output, shape index: {1}]  }
   0x1   :  { %v32_v0 = vld [vmem:[%s650_s2] sm:$0xff]  ;;  %v33_v1 = vld [vmem:[%s650_s2 + $0x8] sm:$0xff]  ;;  %v30_v4 = vld [vmem:[%s648_s0 + $0x10] sm:$0xff] }
   0x2   :  { %v28_v2 = vld [vmem:[%s648_s0] sm:$0xff]  ;;  %v476_v3 = vpack.c.bf16 %v33_v1, %v32_v0  ;;  %459 = vmatprep.mubr.msk.f32.mxu1 %vm41_vm0, %v30_v4 }
   0x3   :  { %456 = vmatprep.mubr.msk.f32.mxu0 %vm41_vm0, %v28_v2 }
   0x4   :  { %14 = vsyncpa [#allocation5], 0  ;;  %477 = vmatprep.subr.bf16.mxu0 %v476_v3  ;;  %480 = vmatprep.subr.bf16.mxu1 %v476_v3  ;;  %v29_v5 = vld [vmem:[%s648_s0 + $0x8] sm:$0xff]  ;;  %v31_v6 = vld [vmem:[%s648_s0 + $0x18] sm:$0xff]  ;;  %vm246_vm1 = vcmask 1042432   ;;  %vm233_vm2 = vcmask 23552  }
   0x5   :  { %479 = vmatpush3.bf16.msra.mxu0 %v476_v3  ;;  %481 = vmatpush3.bf16.msra.mxu1 %v476_v3  ;;  %v232_v7 = vld [vmem:[%s653_s5] sm:$0x7]  ;;  %v229_v10 = vld [vmem:[%s649_s1 + $0x8] sm:$0xff]  ;;  %v230_v11 = vld [vmem:[%s649_s1 + $0x10] sm:$0xff] }
   0x6   :  { %v486_v8 = vld [vmem:[%s652_s4] sm:$0xff]   ;;  %468 = vmatprep.subr.msk.mxu0 %vm246_vm1, %v232_v7  ;;  %v231_v12 = vld [vmem:[%s649_s1 + $0x18] sm:$0xff] }
   0x7   :  { %v228_v9 = vld [vmem:[%s649_s1] sm:$0xff]  ;;  %462 = vmatprep.subr.bf16.mxu1 %v486_v8  ;;  %s535_s1 = smov [#allocation4]  }
   0x8   :  { %457 = vmatmul.mubr.msk.f32.vlgmr.msra.gmra.mrb[0].mxu0 %vm41_vm0, %v29_v5  ;;  %460 = vmatmul.mubr.msk.f32.vlgmr.msra.gmra.mrb[0].mxu1 %vm41_vm0, %v31_v6  ;;  %v387_v13 = vld [vmem:[%s651_s3] ss:$0 sm:$0xff]  ;;  %s372_s3 = sshll.u32 %s535_s1, 4  ;;  %s373_s3 = int_to_ptr.vmem [resolvable:$true] %s372_s3 }
   0x9   :  { %469 = vmatpush3.msk.msra.mxu0 %vm246_vm1, %v232_v7  ;;  %463 = vmatpush3.bf16.msra.mxu1 %v486_v8  ;;  %s487_s23 = scalar_lea.vmem %s373_s3, 256  ;;  %p492_p1 = scmp.lt.s32.totalorder %s373_s3, %s373_s3 }
   0xa   :  { %470 = vmatprep.mubr.msk.f32.mxu0 %vm233_vm2, %v228_v9  ;;  %p488_p0 = scmp.ne.s32.totalorder %s373_s3, %s487_s23  ;;  %p493_p2 = scmp.lt.s32.totalorder %s487_s23, %s487_s23 }
   0xc   :  { %471 = vmatmul.mubr.msk.f32.vlgmr.msra.gmra.mrb[2].mxu0 %vm233_vm2, %v229_v10  ;;  %p494_p3 = por %p493_p2, %p492_p1 }
   0xd   :  { %473 = vmatprep.mubr.msk.f32.mxu0 %vm233_vm2, %v230_v11 }
   0xe   :  { %p495_p4 = pnand %p494_p3, %p488_p0 }
  0x10   :  { %474 = vmatmul.mubr.msk.f32.gmra.mrb[4].mxu0 %vm233_vm2, %v231_v12 }
  0xdb   :  { %v458_v14 = vpop.f32.mrb[0].mxu0  ;;  %v461_v15 = vpop.f32.mrb[0].mxu1 }
  0xdc   :  { %v126_v16 = vadd.f32 %v458_v14, %v387_v13  ;;  %v136_v17 = vadd.f32 %v461_v15, %v387_v13  ;;  %v120_v18 = vpop.f32.mrb[1].mxu0  ;;  %v130_v19 = vpop.f32.mrb[1].mxu1 }
  0xdd   :  { %v121_v20 = vadd.f32 %v387_v13, %v120_v18  ;;  %v131_v21 = vadd.f32 %v387_v13, %v130_v19 }
  0xde   :  { %v140_v22 = vmax.f32 %v126_v16, 0.0  ;;  %v142_v23 = vmax.f32 %v136_v17, 0.0 }
  0xdf   :  { %v139_v24 = vmax.f32 %v121_v20, 0.0  ;;  %v141_v25 = vmax.f32 %v131_v21, 0.0  ;;  %v472_v28 = vpop.f32.mrb[2].mxu0 }
  0xe0   :  { %v316_v29 = vpop.f32.mrb[3].mxu0 }
  0xe1   :  { %v143_v26 = vpack.c.bf16 %v140_v22, %v139_v24  ;;  %v144_v27 = vpack.c.bf16 %v142_v23, %v141_v25  ;;  %v429_v30 = vpack.c.bf16 %v472_v28, %v316_v29 }
  0xe3   :  { %464 = vmatprep.mubr.msk.bf16.mxu1 %vm41_vm0, %v143_v26  ;;  %430 = vst [vmem:[#allocation4] sm:$0xff] %v429_v30   ;;  %v475_v31 = vpop.f32.mrb[4].mxu0 }
  0xe4   :  { %465 = vmatmul.mubr.msk.bf16.vlgmr.msra.gmra.mrb[4].mxu1 %vm41_vm0, %v144_v27  ;;  %v326_v32 = vpop.f32.mrb[5].mxu0 }
  0xe5   :  { %v434_v33 = vpack.c.bf16 %v475_v31, %v326_v32 }
  0xe7   :  { %437 = vst [vmem:[#allocation4 + $0x8] sm:$0xff] %v434_v33  }
  0xe8   :  { %498 = shalt.err (!%p495_p4)
}
  0xe9   :  { %s499_s26 = scalar_lea.hbm %s655_s7, 256 }
  0xea   :  { %p500_p5 = scmp.ne.s32.totalorder %s655_s7, %s499_s26  ;;  %p503_p6 = scmp.lt.u32.totalorder %s499_s26, %s655_s7 }
  0xec   :  { %p505_p7 = pnand %p503_p6, %p500_p5 }
  0xee   :  { %508 = shalt.err (!%p505_p7)
}
  0xef   :  { %s536_s8 = smov 64   ;;  %s537_s2 = smov 4  }
  0xf0   :  { %378 = dma.vmem_to_hbm [thread:$0]  %s373_s3, 256, %s655_s7, [#allocation5], %s536_s8, %s536_s8, %s537_s2  }
  0xf1   :  { %s538_s11 = smov [#allocation2]  }
  0xf2   :  { %s360_s12 = sshll.u32 %s538_s11, 4  ;;  %s361_s12 = int_to_ptr.vmem [resolvable:$true] %s360_s12 }
  0xf3   :  { %s509_s13 = scalar_lea.vmem %s361_s12, 256  ;;  %p514_p9 = scmp.lt.s32.totalorder %s361_s12, %s361_s12 }
  0xf4   :  { %p510_p8 = scmp.ne.s32.totalorder %s361_s12, %s509_s13  ;;  %p515_p10 = scmp.lt.s32.totalorder %s509_s13, %s509_s13 }
  0xf6   :  { %p516_p11 = por %p515_p10, %p514_p9 }
  0xf8   :  { %p517_p12 = pnand %p516_p11, %p510_p8 }
 0x1b7   :  { %v466_v34 = vpop.f32.mrb[4].mxu1 }
 0x1b8   :  { %v193_v35 = vpop.f32.mrb[5].mxu1 }
 0x1b9   :  { %v467_v36 = vpop.f32.mrb[6].mxu1 }
 0x1ba   :  { %v424_v37 = vpack.c.bf16 %v467_v36, %v466_v34  ;;  %v196_v38 = vpop.f32.mrb[7].mxu1 }
 0x1bb   :  { %v419_v39 = vpack.c.bf16 %v196_v38, %v193_v35 }
 0x1bc   :  { %436 = vst [vmem:[#allocation2 + $0x8] sm:$0xff] %v424_v37  }
 0x1bd   :  { %420 = vst [vmem:[#allocation2] sm:$0xff] %v419_v39  }
 0x1be   :  { %520 = shalt.err (!%p517_p12)
}
 0x1bf   :  { %s521_s15 = scalar_lea.hbm %s654_s6, 256 }
 0x1c0   :  { %p522_p13 = scmp.ne.s32.totalorder %s654_s6, %s521_s15  ;;  %p525_p0 = scmp.lt.u32.totalorder %s521_s15, %s654_s6 }
 0x1c2   :  { %p527_p1 = pnand %p525_p0, %p522_p13 }
 0x1c4   :  { %530 = shalt.err (!%p527_p1)
}
 0x1c5   :  { %366 = dma.vmem_to_hbm [thread:$0]  %s361_s12, 256, %s654_s6, [#allocation3], %s536_s8, %s536_s8, %s537_s2  }
 0x1c6   :  { %531 = dma.done.wait [#allocation3], 256  }
 0x1c7   :  { %532 = vsyncadd [#allocation3], 4294967040 }
 0x1c8   :  { %533 = dma.done.wait [#allocation5], 256  }
 0x1c9   :  { %534 = vsyncadd [#allocation5], 4294967040 }
 0x1ca   :  { %385 = vsyncpa [#allocation3], 1 }
 0x1cb   :  { %386 = vsyncpa [#allocation5], 1 }

</bundles_post_ra>
